<compile_context>
chip_gen: v7x
topology: tpu7x:2x2x1
jax: 0.10.0
libtpu: 0.0.40
codegen_flags: <defaults>
</compile_context>

<pallas_src>
import jax
import jax.numpy as jnp
from jax.experimental import pallas as pl
from jax.experimental.pallas import tpu as pltpu


_LANES = 128                      # TPU lane width (last dim of every block)
_SUBLANES = 16                    # sublane multiple (covers f32 (8) and bf16 (16))
_TR_MAX = 512                     # rows per block: 512*128*4B = 256 KiB f32 / buffer
_MEGACORE_MIN_ROWS = 8 * _TR_MAX  # only split across 2 TCs for >= ~2 MiB of f32 gates


def _gate_partial_sum_kernel(x_ref, part_ref, acc_ref):
    """STE-gate a (TR, 128) block and fold it into an (8, 128) accumulator."""
    i = pl.program_id(1)

    @pl.when(i == 0)
    def _init():
        acc_ref[...] = jnp.zeros_like(acc_ref)

    x = x_ref[...]
    # custom_STE forward (hard binarization).  Host zero-padding maps to
    # (0.0 > 0.5) == 0.0, so no validity mask / iota is needed.
    ste = (x > 0.5).astype(jnp.float32)
    tr = ste.shape[0]
    # Row-fold on the VPU (sublane-aligned slab adds); the expensive cross-lane
    # reduction happens exactly once, outside the kernel, on the tiny partials.
    acc_ref[...] += ste.reshape(tr // 8, 8, _LANES).sum(axis=0)

    @pl.when(i == pl.num_programs(1) - 1)
    def _finalize():
        part_ref[0] = acc_ref[...]


def _plan(n_elems):
    """Choose (core_slots, rows_per_block, steps, padded_rows) for n elements."""
    rows = pl.cdiv(n_elems, _LANES)
    rows = max(_SUBLANES, pl.cdiv(rows, _SUBLANES) * _SUBLANES)
    if rows <= _TR_MAX:
        nc, tr, steps = 1, rows, 1
    else:
        tr = _TR_MAX
        nc = 2 if rows >= _MEGACORE_MIN_ROWS else 1
        steps = pl.cdiv(rows, nc * tr)
    rows_padded = nc * steps * tr
    return nc, tr, steps, rows_padded


@jax.jit
def _resource_loss(parts, p):
    n = sum(int(q.size) for q in parts)
    # Keep bf16 gates in bf16 (halves HBM bytes); otherwise stream f32.
    dtype = jnp.bfloat16 if all(q.dtype == jnp.bfloat16 for q in parts) else jnp.float32

    nc, tr, steps, rows_padded = _plan(n)
    pad = rows_padded * _LANES - n

    flat = [q.reshape(-1).astype(dtype) for q in parts]
    if pad:
        flat.append(jnp.zeros((pad,), dtype))
    x2d = jnp.concatenate(flat).reshape(rows_padded, _LANES)

    partials = pl.pallas_call(
        _gate_partial_sum_kernel,
        out_shape=jax.ShapeDtypeStruct((nc, 8, _LANES), jnp.float32),
        grid=(nc, steps),
        in_specs=[pl.BlockSpec((tr, _LANES), lambda c, i: (c * steps + i, 0))],
        out_specs=pl.BlockSpec((1, 8, _LANES), lambda c, i: (c, 0, 0)),
        scratch_shapes=[pltpu.VMEM((8, _LANES), jnp.float32)],
        compiler_params=pltpu.CompilerParams(
            dimension_semantics=("parallel", "arbitrary")),
    )(x2d)

    mean = jnp.sum(partials) / jnp.float32(n)
    return jnp.abs(mean - p.astype(jnp.float32))


class ResourceConstraint:
    """JAX/Pallas port of the PyTorch `resource_constraint` module."""

    def __init__(self, num_epoch, cut_off_epoch, p):
        self.num_epoch = num_epoch
        self.cut_off_epoch = cut_off_epoch
        self.p = float(p)

    def __call__(self, inputs, epoch):
        # Mirrors the PyTorch forward: overall_length / epoch are computed /
        # accepted but do not affect the result.
        overall_length = sum(int(x.shape[0]) for x in inputs)
        del overall_length, epoch
        return _resource_loss(tuple(inputs), jnp.asarray(self.p, dtype=jnp.float32))


if __name__ == "__main__":
    key = jax.random.PRNGKey(0)
    k1, k2, k3, k4, k5 = jax.random.split(key, 5)

    module = ResourceConstraint(num_epoch=10, cut_off_epoch=5, p=0.5)

    # Case 1: small list of 1-D "gate" tensors (single-block path).
    small = [
        jax.random.uniform(k1, (16,), dtype=jnp.float32),
        jax.random.uniform(k2, (32,), dtype=jnp.float32),
        jax.random.uniform(k3, (24,), dtype=jnp.float32),
    ]
    loss_small = module(small, epoch=0)
    jax.block_until_ready(loss_small)
    ref_small = jnp.abs(
        jnp.concatenate([(x > 0.5).astype(jnp.float32) for x in small]).mean() - 0.5)
    assert jnp.allclose(loss_small, ref_small, atol=1e-6), (loss_small, ref_small)

    # Case 2: larger gates to exercise the multi-step accumulator grid.
    big = [
        jax.random.uniform(k4, (70000,), dtype=jnp.float32),
        jax.random.uniform(k5, (12345,), dtype=jnp.float32),
    ]
    loss_big = module(big, epoch=3)
    jax.block_until_ready(loss_big)
    cat = jnp.concatenate([(jnp.ravel(x) > 0.5).astype(jnp.float32) for x in big])
    ref_big = jnp.abs(cat.mean() - 0.5)
    assert jnp.allclose(loss_big, ref_big, atol=1e-6), (loss_big, ref_big)

    print("KERNEL_OK")
</pallas_src>

<mosaic_0001>
module attributes {stable_mosaic.version = 11 : i64} {
  func.func @_gate_partial_sum_kernel(%arg0: i32, %arg1: i32, %arg2: memref<16x128xf32, #tpu.memory_space<vmem>>, %arg3: memref<1x8x128xf32, #tpu.memory_space<vmem>>, %arg4: memref<8x128xf32, #tpu.memory_space<vmem>>) attributes {dimension_semantics = [#tpu.dimension_semantics<parallel>, #tpu.dimension_semantics<arbitrary>], iteration_bounds = array<i64: 1, 1>, scalar_prefetch = 0 : i64, scratch_operands = 1 : i64, tpu.core_type = #tpu.core_type<tc>, window_params = [{transform_indices = @transform_0, window_bounds = array<i64: 16, 128>}, {transform_indices = @transform_1, window_bounds = array<i64: 1, 8, 128>}]} {
    %c0_i32 = arith.constant 0 : i32
    %0 = arith.cmpi eq, %arg1, %c0_i32 : i32
    %1 = arith.extui %0 : i1 to i32
    %c0_i32_0 = arith.constant 0 : i32
    %2 = arith.cmpi ne, %1, %c0_i32_0 : i32
    scf.if %2 {
      %cst_9 = arith.constant 0.000000e+00 : f32
      %16 = vector.broadcast %cst_9 : f32 to vector<8x128xf32>
      %c0_10 = arith.constant 0 : index
      %c0_11 = arith.constant 0 : index
      %17 = vector.load %arg4[%c0_10, %c0_11] : memref<8x128xf32, #tpu.memory_space<vmem>>, vector<8x128xf32>
      tpu.vector_store %arg4[%c0_10, %c0_11], %16 {strides = array<i32>} : memref<8x128xf32, #tpu.memory_space<vmem>>, vector<8x128xf32>,
    } else {
    }
    %c0 = arith.constant 0 : index
    %c0_1 = arith.constant 0 : index
    %3 = vector.load %arg2[%c0, %c0_1] : memref<16x128xf32, #tpu.memory_space<vmem>>, vector<16x128xf32>
    %cst = arith.constant 5.000000e-01 : f32
    %4 = vector.broadcast %cst : f32 to vector<16x128xf32>
    %5 = arith.cmpf ogt, %3, %4 : vector<16x128xf32>
    %6 = arith.extui %5 : vector<16x128xi1> to vector<16x128xi32>
    %7 = arith.sitofp %6 : vector<16x128xi32> to vector<16x128xf32>
    %c0_2 = arith.constant 0 : index
    %c0_3 = arith.constant 0 : index
    %8 = vector.load %arg4[%c0_2, %c0_3] : memref<8x128xf32, #tpu.memory_space<vmem>>, vector<8x128xf32>
    %9 = vector.shape_cast %7 : vector<16x128xf32> to vector<2x8x128xf32>
    %cst_4 = arith.constant dense<0.000000e+00> : vector<8x128xf32>
    %10 = vector.multi_reduction <add>, %9, %cst_4 [0] : vector<2x8x128xf32> to vector<8x128xf32>
    %11 = arith.addf %8, %10 : vector<8x128xf32>
    %c0_5 = arith.constant 0 : index
    %c0_6 = arith.constant 0 : index
    %12 = vector.load %arg4[%c0_5, %c0_6] : memref<8x128xf32, #tpu.memory_space<vmem>>, vector<8x128xf32>
    tpu.vector_store %arg4[%c0_5, %c0_6], %11 {strides = array<i32>} : memref<8x128xf32, #tpu.memory_space<vmem>>, vector<8x128xf32>,
    %c0_i32_7 = arith.constant 0 : i32
    %13 = arith.cmpi eq, %arg1, %c0_i32_7 : i32
    %14 = arith.extui %13 : i1 to i32
    %c0_i32_8 = arith.constant 0 : i32
    %15 = arith.cmpi ne, %14, %c0_i32_8 : i32
    scf.if %15 {
      %c0_9 = arith.constant 0 : index
      %c0_10 = arith.constant 0 : index
      %16 = vector.load %arg4[%c0_9, %c0_10] : memref<8x128xf32, #tpu.memory_space<vmem>>, vector<8x128xf32>
      %c0_11 = arith.constant 0 : index
      %c0_12 = arith.constant 0 : index
      %c0_13 = arith.constant 0 : index
      %17 = vector.load %arg3[%c0_11, %c0_12, %c0_13] : memref<1x8x128xf32, #tpu.memory_space<vmem>>, vector<1x8x128xf32>
      %18 = vector.shape_cast %17 : vector<1x8x128xf32> to vector<8x128xf32>
      %19 = vector.shape_cast %16 : vector<8x128xf32> to vector<1x8x128xf32>
      tpu.vector_store %arg3[%c0_11, %c0_12, %c0_13], %19 {strides = array<i32>} : memref<1x8x128xf32, #tpu.memory_space<vmem>>, vector<1x8x128xf32>,
    } else {
    }
    return
  }
  func.func @transform_0(%arg0: i32, %arg1: i32) -> (i32, i32) {
    %c1_i32 = arith.constant 1 : i32
    %0 = arith.muli %arg0, %c1_i32 : i32
    %1 = arith.addi %0, %arg1 : i32
    %c0_i32 = arith.constant 0 : i32
    %c0_i32_0 = arith.constant 0 : i32
    return %1, %c0_i32 : i32, i32
  }
  func.func @transform_1(%arg0: i32, %arg1: i32) -> (i32, i32, i32) {
    %c0_i32 = arith.constant 0 : i32
    %c0_i32_0 = arith.constant 0 : i32
    %c0_i32_1 = arith.constant 0 : i32
    return %arg0, %c0_i32, %c0_i32_0 : i32, i32, i32
  }
}

</mosaic_0001>

<bundles_post_ra>
// kernel: _resource_loss.1
= control target key start
LH: loop header
LB: loop body
LE: loop exit
PB: predicated region body
PF: predicated region fallthrough
CT: control target
= control target key end

     0   :  { %v65_v2 = vmov 0.0   ;;  %s85_s0 = inlined_call_operand.vmem [shape: f32[16,128], index: 0, kind: input, shape index: {}]   ;;  %s86_s1 = inlined_call_operand.vmem [shape: f32[1,8,128], index: 1, kind: output, shape index: {}]  }
   0x1   :  { %v35_v0 = vld [vmem:[%s85_s0] sm:$0xff]  ;;  %v36_v1 = vld [vmem:[%s85_s0 + $0x8] sm:$0xff] }
   0x2   :  { %vm37_vm0 = vcmp.gt.f32.partialorder %v35_v0, 0.5  ;;  %vm38_vm1 = vcmp.gt.f32.partialorder %v36_v1, 0.5 }
   0x3   :  { %v62_v3 = vsel %vm37_vm0, 1.0, %v65_v2  ;;  %v63_v4 = vsel %vm38_vm1, 1.0, %v65_v2 }
   0x4   :  { %v44_v5 = vadd.f32 %v63_v4, %v62_v3 }
   0x6   :  { %51 = vst [vmem:[%s86_s1] sm:$0xff] %v44_v5 }

</bundles_post_ra>
